<compile_context>
chip_gen: v5e
topology: v5e:2x2
jax: 0.10.0
libtpu: 0.0.40
codegen_flags: <defaults>
</compile_context>

<pallas_src>
import jax
import jax.numpy as jnp
from jax import lax
from jax.experimental import pallas as pl
from jax.experimental.pallas import tpu as pltpu


def _round_up(n, m):
    return ((n + m - 1) // m) * m


def _head_kernel(x_ref, w_ref, b_ref, o_ref):
    # x_ref: (TB, d_sub)  w_ref: (d_sub, Cpad)  b_ref: (1, Cpad)  o_ref: (TB, Cpad)
    acc = lax.dot_general(
        x_ref[...], w_ref[...],
        dimension_numbers=(((1,), (0,)), ((), ())),   # (M,K) x (K,N) MXU feed
        preferred_element_type=jnp.float32,
    )
    o_ref[...] = (acc + b_ref[...]).astype(o_ref.dtype)


class ModifiedHead:
    """JAX/Pallas port of models/all_elastic/msg.py::ModifiedHead."""

    def __init__(self, embed_dim=192, num_classes=100, scale_factors=None,
                 key=None, batch_tile=4096, param_dtype=jnp.bfloat16,
                 out_dtype=None):
        if scale_factors is None:
            scale_factors = [1 / 4, 1 / 2, 1]
        self.scale_factors = scale_factors
        self.embed_dim = embed_dim
        self.num_classes = num_classes
        self._param_dtype = jnp.dtype(param_dtype)
        self._out_dtype = jnp.dtype(out_dtype) if out_dtype is not None else self._param_dtype

        # Deterministic synthetic parameters (module shapes from __init__).
        if key is None:
            key = jax.random.PRNGKey(0)
        kw, kb = jax.random.split(key)
        # Keep a (num_classes, embed_dim) f32 copy for reference / parity with
        # the PyTorch parameter layout.
        self.weight = jax.random.normal(kw, (num_classes, embed_dim), jnp.float32) * 0.02
        self.bias = jax.random.normal(kb, (num_classes,), jnp.float32) * 0.02

        # Pre-transposed, lane-padded kernel-side parameters (built once).
        self._c_pad = _round_up(num_classes, 128)
        self.weight_t_pad = (
            jnp.zeros((embed_dim, self._c_pad), self._param_dtype)
            .at[:, :num_classes].set(self.weight.T.astype(self._param_dtype)))
        self.bias_pad = (
            jnp.zeros((1, self._c_pad), jnp.float32)
            .at[0, :num_classes].set(self.bias))

        # Precompute per-flag sliced weights so forward never pads x or slices
        # the weight at call time (each slice is tiny, <=48 KiB in bf16).
        self._sub_dims = sorted({max(1, int(embed_dim * s)) for s in scale_factors})
        self._w_by_dim = {d: self.weight_t_pad[:d] for d in self._sub_dims}

        min_dim = int(embed_dim * scale_factors[0])
        self.mask = jnp.concatenate(
            [jnp.ones((min_dim,), jnp.float32),
             jnp.zeros((embed_dim - min_dim,), jnp.float32)], axis=0)

        # Batch tile: big tiles amortize the ~0.35us per-step overhead, but cap
        # the double-buffered x+out footprint at ~12 MiB so the kernel fits the
        # 16 MiB scoped-VMEM default on v5e (v6e/v7x default to 32 MiB scoped).
        row_bytes = (embed_dim + self._c_pad) * self._param_dtype.itemsize
        vmem_budget = 12 << 20
        tb_cap = max(8, (vmem_budget // (2 * row_bytes)) // 8 * 8)
        self.batch_tile = max(8, min(_round_up(batch_tile, 8), tb_cap))

        self.current_subset_dim = None

    def configure_subnetwork(self, flag):
        if flag == 's':
            scale = self.scale_factors[0]
        elif flag == 'm':
            scale = self.scale_factors[1]
        else:
            scale = self.scale_factors[2]
        self.current_subset_dim = int(self.embed_dim * scale)

    # TODO(synk): expand_subnetwork_fpi / updata_mask / set_mask_inference are
    # training-time in-place parameter surgery; they don't affect the forward
    # pass and are not ported here.

    def __call__(self, x, return_padded=False):
        if self.current_subset_dim is None:
            raise ValueError(
                'Subnetwork size not configured. Call `configure_subnetwork` first.')
        d_sub = self.current_subset_dim
        C = self.num_classes
        Cpad = self._c_pad

        # F.linear works on (..., d_sub); flatten leading dims for the kernel.
        orig_lead = x.shape[:-1]
        if x.shape[-1] != d_sub:
            raise ValueError(f'expected last dim {d_sub}, got {x.shape[-1]}')
        if x.ndim != 2:
            x = x.reshape(-1, d_sub)
        B = x.shape[0]

        # Per-flag weight slice, precomputed at init (no per-call HBM copy).
        w = self._w_by_dim.get(d_sub, self.weight_t_pad[:d_sub])

        # Cast activations onto the bf16 DMA path; a no-op when the backbone
        # already runs in bf16 (the usual case).
        if x.dtype != self._param_dtype:
            x = x.astype(self._param_dtype)

        # Tile selection: single tile for small batches; for large batches keep
        # >=4 grid steps (so v7x's two TensorCores can split the parallel axis)
        # but never shrink below 512 rows (per-step overhead amortization).
        tb = min(self.batch_tile, _round_up(B, 8))
        if B > 4 * 512:
            tb = min(tb, max(512, _round_up(pl.cdiv(B, 4), 8)))
        num_tiles = pl.cdiv(B, tb)   # partial last tile: OOB out rows dropped

        itm = self._param_dtype.itemsize
        cost = pl.CostEstimate(
            flops=2 * B * d_sub * Cpad,
            transcendentals=0,
            bytes_accessed=(B * d_sub * itm + d_sub * Cpad * itm
                            + Cpad * 4 + B * Cpad * self._out_dtype.itemsize))

        out = pl.pallas_call(
            _head_kernel,
            out_shape=jax.ShapeDtypeStruct((B, Cpad), self._out_dtype),
            grid=(num_tiles,),
            in_specs=[
                pl.BlockSpec((tb, d_sub), lambda i: (i, 0)),     # batch-tiled x
                pl.BlockSpec((d_sub, Cpad), lambda i: (0, 0)),   # resident weight
                pl.BlockSpec((1, Cpad), lambda i: (0, 0)),       # resident bias
            ],
            out_specs=pl.BlockSpec((tb, Cpad), lambda i: (i, 0)),
            compiler_params=pltpu.CompilerParams(
                dimension_semantics=("parallel",)),
            cost_estimate=cost,
        )(x, w, self.bias_pad)

        # PyTorch forward resets the configured dim after use.
        self.current_subset_dim = None

        if return_padded:
            return out                      # (B, Cpad); caller fuses the slice
        if Cpad != C:
            out = out[:, :C]
        if len(orig_lead) != 1:
            out = out.reshape(*orig_lead, C)
        return out


if __name__ == "__main__":
    key = jax.random.PRNGKey(0)
    k_param, k_x = jax.random.split(key)

    embed_dim = 32
    num_classes = 16
    batch = 8

    # 1) Exact-precision path (f32 params/activations) vs. plain-JAX reference
    #    for all three elastic flags.
    head_f32 = ModifiedHead(embed_dim=embed_dim, num_classes=num_classes,
                            key=k_param, param_dtype=jnp.float32,
                            out_dtype=jnp.float32)
    for flag in ('s', 'm', 'full'):
        head_f32.configure_subnetwork(flag)
        d_sub = head_f32.current_subset_dim
        x = jax.random.normal(jax.random.fold_in(k_x, d_sub),
                              (batch, d_sub), jnp.float32)
        out = jax.block_until_ready(head_f32(x))
        ref = x @ head_f32.weight[:, :d_sub].T + head_f32.bias
        assert out.shape == (batch, num_classes)
        assert jnp.allclose(out, ref, atol=1e-5, rtol=1e-5), flag

    # 2) Performance-default path (bf16 params/activations/output).
    head_bf16 = ModifiedHead(embed_dim=embed_dim, num_classes=num_classes,
                             key=k_param)
    head_bf16.configure_subnetwork('full')
    x_bf16 = jax.random.normal(k_x, (batch, embed_dim), jnp.bfloat16)
    out_bf16 = jax.block_until_ready(head_bf16(x_bf16))
    ref_bf16 = (x_bf16.astype(jnp.float32)
                @ head_bf16.weight_t_pad[:, :num_classes].astype(jnp.float32)
                + head_bf16.bias)
    assert out_bf16.shape == (batch, num_classes)
    assert jnp.allclose(out_bf16.astype(jnp.float32), ref_bf16,
                        atol=2e-2, rtol=2e-2)

    print("KERNEL_OK")
</pallas_src>

<mosaic_0001>
module attributes {stable_mosaic.version = 11 : i64} {
  func.func @_head_kernel(%arg0: i32, %arg1: memref<8x8xf32, #tpu.memory_space<vmem>>, %arg2: memref<8x128xf32, #tpu.memory_space<vmem>>, %arg3: memref<1x128xf32, #tpu.memory_space<vmem>>, %arg4: memref<8x128xf32, #tpu.memory_space<vmem>>) attributes {dimension_semantics = [#tpu.dimension_semantics<parallel>], iteration_bounds = array<i64: 1>, scalar_prefetch = 0 : i64, scratch_operands = 0 : i64, tpu.core_type = #tpu.core_type<tc>, window_params = [{transform_indices = @transform_0, window_bounds = array<i64: 8, 8>}, {pipeline_mode = #tpu.pipeline_mode<synchronous>, transform_indices = @transform_1, window_bounds = array<i64: 8, 128>}, {pipeline_mode = #tpu.pipeline_mode<synchronous>, transform_indices = @transform_2, window_bounds = array<i64: 1, 128>}, {transform_indices = @transform_3, window_bounds = array<i64: 8, 128>}]} {
    %c0 = arith.constant 0 : index
    %c0_0 = arith.constant 0 : index
    %0 = vector.load %arg1[%c0, %c0_0] : memref<8x8xf32, #tpu.memory_space<vmem>>, vector<8x8xf32>
    %c0_1 = arith.constant 0 : index
    %c0_2 = arith.constant 0 : index
    %1 = vector.load %arg2[%c0_1, %c0_2] : memref<8x128xf32, #tpu.memory_space<vmem>>, vector<8x128xf32>
    %cst = arith.constant dense<0.000000e+00> : vector<8x128xf32>
    %2 = tpu.matmul %0, %1, %cst {dimension_numbers = #tpu.dot_dimension_numbers<[1], [0], [0], [1], [0, 0, 1, 1], [], []>} : vector<8x8xf32>, vector<8x128xf32>, vector<8x128xf32> -> vector<8x128xf32>
    %c0_3 = arith.constant 0 : index
    %c0_4 = arith.constant 0 : index
    %3 = vector.load %arg3[%c0_3, %c0_4] : memref<1x128xf32, #tpu.memory_space<vmem>>, vector<1x128xf32>
    %4 = vector.broadcast %3 : vector<1x128xf32> to vector<8x128xf32>
    %5 = arith.addf %2, %4 : vector<8x128xf32>
    %c0_5 = arith.constant 0 : index
    %c0_6 = arith.constant 0 : index
    %6 = vector.load %arg4[%c0_5, %c0_6] : memref<8x128xf32, #tpu.memory_space<vmem>>, vector<8x128xf32>
    tpu.vector_store %arg4[%c0_5, %c0_6], %5 {strides = array<i32>} : memref<8x128xf32, #tpu.memory_space<vmem>>, vector<8x128xf32>,
    return
  }
  func.func @transform_0(%arg0: i32) -> (i32, i32) {
    %c0_i32 = arith.constant 0 : i32
    %c0_i32_0 = arith.constant 0 : i32
    return %arg0, %c0_i32 : i32, i32
  }
  func.func @transform_1(%arg0: i32) -> (i32, i32) {
    %c0_i32 = arith.constant 0 : i32
    %c0_i32_0 = arith.constant 0 : i32
    %c0_i32_1 = arith.constant 0 : i32
    return %c0_i32, %c0_i32_0 : i32, i32
  }
  func.func @transform_2(%arg0: i32) -> (i32, i32) {
    %c0_i32 = arith.constant 0 : i32
    %c0_i32_0 = arith.constant 0 : i32
    %c0_i32_1 = arith.constant 0 : i32
    return %c0_i32, %c0_i32_0 : i32, i32
  }
  func.func @transform_3(%arg0: i32) -> (i32, i32) {
    %c0_i32 = arith.constant 0 : i32
    %c0_i32_0 = arith.constant 0 : i32
    return %arg0, %c0_i32 : i32, i32
  }
}

</mosaic_0001>

<bundles_post_ra>
// kernel: tpu_custom_call.1
= control target key start
LH: loop header
LB: loop body
LE: loop exit
PB: predicated region body
PF: predicated region fallthrough
CT: control target
= control target key end

     0   :  { %8 = vsyncpa [#allocation3], 0  ;;  %s210_s0 = inlined_call_operand.hbm [shape: f32[8,8], index: 0, kind: input, shape index: {}]   ;;  %s211_s1 = inlined_call_operand.hbm [shape: f32[8,128], index: 1, kind: input, shape index: {}]   ;;  %s212_s2 = inlined_call_operand.vmem [shape: f32[1,128], index: 2, kind: input, shape index: {}]   ;;  %s213_s3 = inlined_call_operand.hbm [shape: f32[8,128], index: 3, kind: output, shape index: {}]  }
   0x1   :  { %9 = vsyncpa [#allocation6], 0 }
   0x2   :  { %10 = vsyncpa [#allocation4], 0  ;;  %s16_s14 = sshll.u32 %s210_s0, 4  ;;  %s175_s15 = smov [#allocation2]   ;;  %s17_s14 = int_to_ptr.hbm [resolvable:$true] %s16_s14 }
   0x3   :  { %s18_s16 = sshll.u32 %s175_s15, 4  ;;  %s27_s19 = sshll.u32 %s211_s1, 4  ;;  %s19_s16 = int_to_ptr.vmem [resolvable:$true] %s18_s16  ;;  %s28_s19 = int_to_ptr.hbm [resolvable:$true] %s27_s19 }
   0x4   :  { %21 = dma.hbm_to_vmem [thread:$0]  %s17_s14, 128, %s19_s16, [#allocation3]  }
   0x5   :  { %s176_s20 = smov [#allocation5]  }
   0x6   :  { %s29_s21 = sshll.u32 %s176_s20, 4  ;;  %s30_s21 = int_to_ptr.vmem [resolvable:$true] %s29_s21 }
   0x7   :  { %32 = dma.hbm_to_vmem [thread:$0]  %s28_s19, 128, %s30_s21, [#allocation6]  }
   0x8   :  { %169 = dma.done.wait [#allocation3], 128  }
   0x9   :  { %170 = vsyncadd [#allocation3], 4294967168 }
   0xa   :  { %171 = dma.done.wait [#allocation6], 128  }
   0xb   :  { %172 = vsyncadd [#allocation6], 4294967168  ;;  %vm49_vm0 = vcmask 64512   ;;  %v44_v0 = vld [vmem:[#allocation5] sm:$0xff]  ;;  %v43_v1 = vld [vmem:[#allocation2] sm:$0xff]  ;;  %s177_s1 = smov [#allocation7]  }
   0xc   :  { %68 = vmatpush.msra.mxu0 %v44_v0  ;;  %v96_v2 = vld [vmem:[%s212_s2] ss:$0 sm:$0xff]  ;;  %s79_s23 = sshll.u32 %s177_s1, 4  ;;  %s81_s26 = sshll.u32 %s213_s3, 4  ;;  %s80_s23 = int_to_ptr.vmem [resolvable:$true] %s79_s23  ;;  %s82_s26 = int_to_ptr.hbm [resolvable:$true] %s81_s26 }
   0xd   :  { %92 = vmatmul.msk.f32.vlgmr.msra.gmra.mxu0 %vm49_vm0, %v43_v1 }
  0x8a   :  { %v70_v3 = vpop.f32.mrf.mxu0 }
  0x8b   :  { %v71_v4 = vadd.f32 %v96_v2, %v70_v3 }
  0x8d   :  { %73 = vst [vmem:[#allocation7] sm:$0xff] %v71_v4 }
  0x8e   :  { %84 = dma.vmem_to_hbm [thread:$0]  %s80_s23, 128, %s82_s26, [#allocation4]  }
  0x8f   :  { %173 = dma.done.wait [#allocation4], 128  }
  0x90   :  { %174 = vsyncadd [#allocation4], 4294967168 }
  0x91   :  { %89 = vsyncpa [#allocation3], 1 }
  0x92   :  { %90 = vsyncpa [#allocation6], 1 }
  0x93   :  { %91 = vsyncpa [#allocation4], 1 }

</bundles_post_ra>
